<compile_context>
chip_gen: v7x
topology: tpu7x:2x2x1
jax: 0.10.0
libtpu: 0.0.40
codegen_flags: <defaults>
</compile_context>

<pallas_src>
import functools

import jax
import jax.numpy as jnp
from jax.experimental import pallas as pl
from jax.experimental.pallas import tpu as pltpu


def _silu_kernel(x_ref, o_ref, *, compute_dtype):
    x = x_ref[...].astype(compute_dtype)
    # tanh-form sigmoid: x*sigmoid(x) == 0.5*x*(1 + tanh(x/2)); one EUP op.
    o_ref[...] = (0.5 * x * (1.0 + jnp.tanh(0.5 * x))).astype(o_ref.dtype)


_TARGET_BLOCK_BYTES = 4 * 1024 * 1024   # ~4 MiB blocks: per-step overhead amortized
_MAX_COLS = 8192
_MIB = 1024 * 1024


def _round_up(v, m):
    return ((v + m - 1) // m) * m


def _sublane_pack(itemsize):
    # f32 -> 8, bf16/f16 -> 16, int8/fp8 -> 32 rows per packed sublane tile.
    return 8 * max(1, 4 // itemsize)


def _tpu_config():
    """(has_native_bf16, vmem_cap_bytes) -- best effort, safe defaults."""
    kind = ""
    try:
        kind = jax.devices()[0].device_kind.lower()
    except Exception:
        pass
    is_v7 = "v7" in kind
    # bf16 VPU/EUP exists on v6e and later; v5e (and unknown chips) use f32.
    has_native_bf16 = ("v6" in kind) or is_v7
    # Scoped-VMEM ceiling we are willing to request; v7x has only 64 MiB
    # physical VMEM (vs 128 MiB on v5e/v6e), so stay well below that.
    vmem_cap = (48 if is_v7 else 96) * _MIB
    try:  # refine from the runtime if available
        phys = int(pltpu.get_tpu_info().vmem_capacity_bytes)
        vmem_cap = min(vmem_cap, (phys * 3) // 4)
    except Exception:
        pass
    return has_native_bf16, vmem_cap


def silu(x):
    """Elementwise SiLU via Pallas. Accepts any shape / float dtype."""
    orig_shape = x.shape
    orig_dtype = x.dtype
    total = int(x.size)
    if total == 0:
        return x

    if total % 128 != 0:
        # Ragged total: Pallas on the 128-aligned prefix, plain XLA on the
        # (< 128-element) tail.  Avoids the full-array pad + output slice of a
        # padded fallback; still one extra read+write vs the aligned path, so
        # callers should prefer 128-divisible activation sizes.
        flat = x.reshape(-1)
        aligned = (total // 128) * 128
        tail = flat[aligned:]
        tail_out = tail * jax.nn.sigmoid(tail)
        if aligned == 0:
            return tail_out.reshape(orig_shape)
        head_out = silu(flat[:aligned]).reshape(-1)
        return jnp.concatenate([head_out, tail_out]).reshape(orig_shape)

    itemsize = jnp.dtype(orig_dtype).itemsize
    sub = _sublane_pack(itemsize)
    has_native_bf16, vmem_cap = _tpu_config()

    # Compute dtype: native bf16 on chips with a bf16 VPU/EUP, f32 otherwise.
    if orig_dtype == jnp.bfloat16 and has_native_bf16:
        compute_dtype = jnp.bfloat16
    else:
        compute_dtype = jnp.float32

    # ---- lane-dense zero-copy 2D folding (rows, cols) -----------------------
    cols = 128
    for c in (_MAX_COLS, 4096, 2048, 1024, 512, 256, 128):
        if total % c == 0:
            cols = c
            break
    rows = total // cols
    x2d = x.reshape(rows, cols)

    # ---- byte-budgeted row tile ---------------------------------------------
    tr = _TARGET_BLOCK_BYTES // (cols * itemsize)
    tr = max(sub, (tr // sub) * sub)            # multiple of the sublane pack
    if rows > sub:
        # Guarantee >= 2 grid steps: both v7x TensorCores get work and the
        # DMA-in / compute / DMA-out pipeline actually overlaps.
        tr = min(tr, _round_up(pl.cdiv(rows, 2), sub))
        # Prefer an even step count so the 2-TC split is balanced.
        steps = pl.cdiv(rows, tr)
        if steps > 1 and steps % 2 == 1:
            tr_even = max(sub, _round_up(pl.cdiv(rows, steps + 1), sub))
            if pl.cdiv(rows, tr_even) % 2 == 0:
                tr = tr_even
    else:
        tr = rows                               # tiny array: single full block

    grid = (pl.cdiv(rows, tr),)

    # VMEM budget: double-buffered input + output blocks plus headroom for
    # compute-dtype temporaries, capped per generation (v7x: 64 MiB physical).
    block_bytes = tr * cols * itemsize
    compute_block_bytes = tr * cols * jnp.dtype(compute_dtype).itemsize
    live = 4 * block_bytes + 2 * compute_block_bytes
    vmem_limit = int(min(vmem_cap, max(live + live // 2, 16 * _MIB)))

    kernel = functools.partial(_silu_kernel, compute_dtype=compute_dtype)
    out2d = pl.pallas_call(
        kernel,
        out_shape=jax.ShapeDtypeStruct((rows, cols), orig_dtype),
        grid=grid,
        # NOTE: if xprof ever shows exposed DMA at block boundaries, add
        # pipeline_mode=pl.Buffered(3) on the input spec (and re-check the
        # v7x VMEM budget).
        in_specs=[pl.BlockSpec((tr, cols), lambda i: (i, 0))],
        out_specs=pl.BlockSpec((tr, cols), lambda i: (i, 0)),
        compiler_params=pltpu.CompilerParams(
            dimension_semantics=("parallel",),
            vmem_limit_bytes=vmem_limit,
        ),
    )(x2d)

    return out2d.reshape(orig_shape)


if __name__ == "__main__":
    def ref_silu(v):
        vf = v.astype(jnp.float32)
        return (vf * jax.nn.sigmoid(vf)).astype(v.dtype)

    key = jax.random.PRNGKey(0)

    # NCHW input, small shapes: batch=2, channels=4, spatial=16x16.
    x = jax.random.normal(key, (2, 4, 16, 16), dtype=jnp.float32)
    y = jax.block_until_ready(silu(x))
    assert y.shape == x.shape and y.dtype == x.dtype
    assert jnp.allclose(y, ref_silu(x), atol=1e-5, rtol=1e-5)

    # Ragged total (135 elems): 128-aligned prefix via Pallas + plain-XLA tail.
    x2 = jax.random.normal(jax.random.PRNGKey(1), (3, 5, 9), dtype=jnp.float32)
    y2 = jax.block_until_ready(silu(x2))
    assert y2.shape == x2.shape and y2.dtype == x2.dtype
    assert jnp.allclose(y2, ref_silu(x2), atol=1e-5, rtol=1e-5)

    # bf16 path (native bf16 compute on v6e/v7x, f32 compute on v5e/unknown).
    x3 = jax.random.normal(jax.random.PRNGKey(2), (8, 32, 128), dtype=jnp.bfloat16)
    y3 = jax.block_until_ready(silu(x3))
    assert y3.shape == x3.shape and y3.dtype == x3.dtype
    assert jnp.allclose(y3.astype(jnp.float32), ref_silu(x3).astype(jnp.float32),
                        atol=3e-2, rtol=3e-2)

    print("KERNEL_OK")
</pallas_src>

<mosaic_0001>
module attributes {stable_mosaic.version = 11 : i64} {
  func.func @_silu_kernel(%arg0: i32, %arg1: memref<1x2048xf32, #tpu.memory_space<vmem>>, %arg2: memref<1x2048xf32, #tpu.memory_space<vmem>>) attributes {dimension_semantics = [#tpu.dimension_semantics<parallel>], iteration_bounds = array<i64: 1>, scalar_prefetch = 0 : i64, scratch_operands = 0 : i64, tpu.core_type = #tpu.core_type<tc>, window_params = [{transform_indices = @transform_0, window_bounds = array<i64: 1, 2048>}, {transform_indices = @transform_1, window_bounds = array<i64: 1, 2048>}]} {
    %c0 = arith.constant 0 : index
    %c0_0 = arith.constant 0 : index
    %0 = vector.load %arg1[%c0, %c0_0] : memref<1x2048xf32, #tpu.memory_space<vmem>>, vector<1x2048xf32>
    %cst = arith.constant 5.000000e-01 : f32
    %1 = vector.broadcast %cst : f32 to vector<1x2048xf32>
    %2 = arith.mulf %1, %0 : vector<1x2048xf32>
    %cst_1 = arith.constant 5.000000e-01 : f32
    %3 = vector.broadcast %cst_1 : f32 to vector<1x2048xf32>
    %4 = arith.mulf %3, %0 : vector<1x2048xf32>
    %5 = math.tanh %4 : vector<1x2048xf32>
    %cst_2 = arith.constant 1.000000e+00 : f32
    %6 = vector.broadcast %cst_2 : f32 to vector<1x2048xf32>
    %7 = arith.addf %6, %5 : vector<1x2048xf32>
    %8 = arith.mulf %2, %7 : vector<1x2048xf32>
    %c0_3 = arith.constant 0 : index
    %c0_4 = arith.constant 0 : index
    %9 = vector.load %arg2[%c0_3, %c0_4] : memref<1x2048xf32, #tpu.memory_space<vmem>>, vector<1x2048xf32>
    tpu.vector_store %arg2[%c0_3, %c0_4], %8 {strides = array<i32>} : memref<1x2048xf32, #tpu.memory_space<vmem>>, vector<1x2048xf32>,
    return
  }
  func.func @transform_0(%arg0: i32) -> (i32, i32) {
    %c0_i32 = arith.constant 0 : i32
    %c0_i32_0 = arith.constant 0 : i32
    return %arg0, %c0_i32 : i32, i32
  }
  func.func @transform_1(%arg0: i32) -> (i32, i32) {
    %c0_i32 = arith.constant 0 : i32
    %c0_i32_0 = arith.constant 0 : i32
    return %arg0, %c0_i32 : i32, i32
  }
}

</mosaic_0001>

<bundles_post_ra>
// kernel: tpu_custom_call.1
= control target key start
LH: loop header
LB: loop body
LE: loop exit
PB: predicated region body
PF: predicated region fallthrough
CT: control target
= control target key end

     0   :  { %6 = vsyncpa [#allocation3], 0  ;;  %s138_s0 = inlined_call_operand.hbm [shape: f32[1,2048], index: 0, kind: input, shape index: {}]   ;;  %s139_s1 = inlined_call_operand.hbm [shape: f32[1,2048], index: 1, kind: output, shape index: {}]  }
   0x1   :  { %7 = vsyncpa [#allocation4], 0  ;;  %s102_s6 = smov [#allocation2]   ;;  %s54_s10 = scalar_lea.hbm %s138_s0, 256 }
   0x2   :  { %s14_s7 = sshll.u32 %s102_s6, 4  ;;  %p55_p0 = scmp.ne.s32.totalorder %s138_s0, %s54_s10  ;;  %s15_s7 = int_to_ptr.vmem [resolvable:$true] %s14_s7 }
   0x3   :  { %p58_p1 = scmp.lt.u32.totalorder %s54_s10, %s138_s0 }
   0x5   :  { %p60_p2 = pnand %p58_p1, %p55_p0 }
   0x7   :  { %63 = shalt.err (!%p60_p2)
}
   0x8   :  { %s64_s15 = scalar_lea.vmem %s15_s7, 256  ;;  %p69_p4 = scmp.lt.s32.totalorder %s15_s7, %s15_s7 }
   0x9   :  { %p65_p3 = scmp.ne.s32.totalorder %s15_s7, %s64_s15  ;;  %p70_p5 = scmp.lt.s32.totalorder %s64_s15, %s64_s15 }
   0xb   :  { %p71_p6 = por %p70_p5, %p69_p4 }
   0xd   :  { %p72_p7 = pnand %p71_p6, %p65_p3 }
   0xf   :  { %75 = shalt.err (!%p72_p7)
}
  0x10   :  { %17 = dma.hbm_to_vmem [thread:$0]  %s138_s0, 256, %s15_s7, [#allocation3]  }
  0x11   :  { %98 = dma.done.wait [#allocation3], 256  }
  0x12   :  { %99 = vsyncadd [#allocation3], 4294967040  ;;  %v21_v0 = vld [vmem:[#allocation2] sm:$0xff]  ;;  %v22_v1 = vld [vmem:[#allocation2 + $0x8] sm:$0xff]  ;;  %s103_s18 = smov [#allocation5]  }
  0x13   :  { %v23_v2 = vmul.f32 0.5, %v21_v0  ;;  %v24_v3 = vmul.f32 0.5, %v22_v1  ;;  %s39_s19 = sshll.u32 %s103_s18, 4  ;;  %s40_s19 = int_to_ptr.vmem [resolvable:$true] %s39_s19 }
  0x14   :  { %s76_s0 = scalar_lea.vmem %s40_s19, 256  ;;  %p81_p9 = scmp.lt.s32.totalorder %s40_s19, %s40_s19 }
  0x15   :  { %50 = vtanh.f32 %v23_v2  ;;  %p77_p8 = scmp.ne.s32.totalorder %s40_s19, %s76_s0  ;;  %p82_p10 = scmp.lt.s32.totalorder %s76_s0, %s76_s0 }
  0x16   :  { %52 = vtanh.f32 %v24_v3 }
  0x17   :  { %p83_p11 = por %p82_p10, %p81_p9 }
  0x19   :  { %p84_p12 = pnand %p83_p11, %p77_p8 }
  0x1f   :  { %v51_v4 = vpop.eup %50 }
  0x20   :  { %v53_v5 = vpop.eup %52  ;;  %v27_v6 = vadd.f32 1.0, %v51_v4 }
  0x21   :  { %v28_v7 = vadd.f32 1.0, %v53_v5 }
  0x22   :  { %v29_v8 = vmul.f32 %v27_v6, %v23_v2 }
  0x23   :  { %v30_v9 = vmul.f32 %v28_v7, %v24_v3 }
  0x24   :  { %31 = vst [vmem:[#allocation5] sm:$0xff] %v29_v8 }
  0x25   :  { %32 = vst [vmem:[#allocation5 + $0x8] sm:$0xff] %v30_v9 }
  0x26   :  { %87 = shalt.err (!%p84_p12)
}
  0x27   :  { %s88_s22 = scalar_lea.hbm %s139_s1, 256 }
  0x28   :  { %p89_p13 = scmp.ne.s32.totalorder %s139_s1, %s88_s22  ;;  %p92_p0 = scmp.lt.u32.totalorder %s88_s22, %s139_s1 }
  0x2a   :  { %p94_p1 = pnand %p92_p0, %p89_p13 }
  0x2c   :  { %97 = shalt.err (!%p94_p1)
}
  0x2d   :  { %42 = dma.vmem_to_hbm [thread:$0]  %s40_s19, 256, %s139_s1, [#allocation4]  }
  0x2e   :  { %100 = dma.done.wait [#allocation4], 256  }
  0x2f   :  { %101 = vsyncadd [#allocation4], 4294967040 }
  0x30   :  { %46 = vsyncpa [#allocation3], 1 }
  0x31   :  { %47 = vsyncpa [#allocation4], 1 }

</bundles_post_ra>
